<compile_context>
chip_gen: v7x
topology: tpu7x:2x2x1
jax: 0.10.0
libtpu: 0.0.40
codegen_flags: <defaults>
</compile_context>

<pallas_src>
import functools
import math

import jax
import jax.numpy as jnp
from jax import lax
from jax.experimental import pallas as pl
from jax.experimental.pallas import tpu as pltpu


def qnet_kernel(x_ref, w1_ref, b1_ref, w2_ref, b2_ref, out_ref):
    """x:(bm,Din)  w1:(Din,H)  b1:(1,H)  w2:(Dout,H)  b2:(Dout,1)  out:(Dout,bm).

    Both layers, bias adds and the ReLU are fused; the hidden activation stays
    a traced value (no VMEM scratch / HBM round-trip).  The output is produced
    transposed so its minor (lane) dim is the wide batch tile.
    """
    h = jnp.dot(x_ref[...], w1_ref[...], preferred_element_type=jnp.float32)
    h = jnp.maximum(h + b1_ref[...], 0.0)                      # fused bias + ReLU (f32)
    # Second layer as W2 @ h^T  -> (Dout, bm): lane-dense, unmasked stores.
    out_t = lax.dot_general(
        w2_ref[...], h.astype(w2_ref.dtype),
        dimension_numbers=(((1,), (1,)), ((), ())),
        preferred_element_type=jnp.float32)
    out_ref[...] = (out_t + b2_ref[...]).astype(out_ref.dtype)


def _round_up(x, m):
    return ((x + m - 1) // m) * m


@functools.partial(jax.jit, static_argnames=("block_m",))
def linear_qnet_forward(x, w1, b1, w2, b2, *, block_m=8192):
    """x:(N,Din); w1:(H,Din), b1:(H,), w2:(Dout,H), b2:(Dout,)  (PyTorch layouts)."""
    n, d_in = x.shape
    hidden = w1.shape[0]
    d_out = w2.shape[0]

    # Stream x in the caller's dtype (bf16 callers get half the HBM traffic);
    # weights follow x's dtype (they're tiny).  Accumulation stays f32 in-kernel.
    compute_dtype = x.dtype
    w1t = jnp.transpose(w1).astype(compute_dtype)        # (Din, H) — one-time, tiny
    w2c = w2.astype(compute_dtype)                       # (Dout, H) — PyTorch layout kept
    b1r = b1.reshape(1, hidden).astype(jnp.float32)      # broadcast over sublanes
    b2r = b2.reshape(d_out, 1).astype(jnp.float32)       # broadcast over lanes

    # Batch tile: big enough to amortize the ~0.35 us/step grid overhead; small-N
    # calls are bucketed to powers of two (>=128) so each bucket compiles once.
    # bm is always a multiple of 128 so it sits cleanly on the output lane axis
    # (and satisfies bf16 sublane packing on the x tile).
    bm = min(_round_up(block_m, 128), max(128, pl.next_power_of_2(n)))
    grid = (pl.cdiv(n, bm),)     # no jnp.pad: partial last block is masked by Pallas

    out_t = pl.pallas_call(
        qnet_kernel,
        out_shape=jax.ShapeDtypeStruct((d_out, n), compute_dtype),
        grid=grid,
        in_specs=[
            pl.BlockSpec((bm, d_in), lambda i: (i, 0)),        # x tile per step
            pl.BlockSpec((d_in, hidden), lambda i: (0, 0)),    # weights stay VMEM-resident
            pl.BlockSpec((1, hidden), lambda i: (0, 0)),
            pl.BlockSpec((d_out, hidden), lambda i: (0, 0)),
            pl.BlockSpec((d_out, 1), lambda i: (0, 0)),
        ],
        out_specs=pl.BlockSpec((d_out, bm), lambda i: (0, i)), # lane-dense output tile
        compiler_params=pltpu.CompilerParams(
            dimension_semantics=("parallel",),                 # batch across TCs (v7x)
            vmem_limit_bytes=32 * 1024 * 1024,
        ),
    )(x, w1t, b1r, w2c, b2r)

    return jnp.transpose(out_t)                                # (N, Dout), tiny


def reference_forward(x, w1, b1, w2, b2):
    """Pure-JAX reference reproducing the PyTorch forward."""
    h = jax.nn.relu(x @ w1.T + b1)
    return h @ w2.T + b2


if __name__ == "__main__":
    key = jax.random.PRNGKey(0)
    k1, k2, k3, k4, k5, k6 = jax.random.split(key, 6)

    # Snake-style Q-net shapes: 11 -> 256 -> 3.
    IN, HID, OUT = 11, 256, 3
    b1_bound = 1.0 / math.sqrt(IN)
    b2_bound = 1.0 / math.sqrt(HID)
    w1 = jax.random.uniform(k2, (HID, IN), jnp.float32, -b1_bound, b1_bound)
    b1 = jax.random.uniform(k3, (HID,), jnp.float32, -b1_bound, b1_bound)
    w2 = jax.random.uniform(k4, (OUT, HID), jnp.float32, -b2_bound, b2_bound)
    b2 = jax.random.uniform(k5, (OUT,), jnp.float32, -b2_bound, b2_bound)

    # 1) Small-batch f32 check.
    x_small = jax.random.normal(k1, (2, IN), jnp.float32)
    out = jax.block_until_ready(linear_qnet_forward(x_small, w1, b1, w2, b2))
    ref = reference_forward(x_small, w1, b1, w2, b2)
    assert out.shape == (2, OUT), out.shape
    assert jnp.allclose(out, ref, atol=1e-4, rtol=1e-4), (out, ref)

    # 2) Non-divisible batch with a multi-step grid: exercises the masked
    #    partial last block (no jnp.pad path).
    x_big = jax.random.normal(k6, (300, IN), jnp.float32)
    out_big = jax.block_until_ready(
        linear_qnet_forward(x_big, w1, b1, w2, b2, block_m=128))
    ref_big = reference_forward(x_big, w1, b1, w2, b2)
    assert out_big.shape == (300, OUT), out_big.shape
    assert jnp.allclose(out_big, ref_big, atol=1e-4, rtol=1e-4)

    # 3) bf16-streamed x (half the HBM traffic), f32 accumulation in-kernel.
    out_bf16 = jax.block_until_ready(
        linear_qnet_forward(x_big.astype(jnp.bfloat16), w1, b1, w2, b2, block_m=128))
    assert jnp.allclose(out_bf16.astype(jnp.float32), ref_big, atol=5e-2, rtol=5e-2)

    # TODO(synk): Linear_QNet.save/load (torch file I/O) and the __init__ print
    # have no kernel equivalent and are intentionally omitted.
    print("KERNEL_OK")
</pallas_src>

<mosaic_0001>
module attributes {stable_mosaic.version = 11 : i64} {
  func.func @qnet_kernel(%arg0: i32, %arg1: memref<128x11xf32, #tpu.memory_space<vmem>>, %arg2: memref<11x256xf32, #tpu.memory_space<vmem>>, %arg3: memref<1x256xf32, #tpu.memory_space<vmem>>, %arg4: memref<3x256xf32, #tpu.memory_space<vmem>>, %arg5: memref<3x1xf32, #tpu.memory_space<vmem>>, %arg6: memref<3x128xf32, #tpu.memory_space<vmem>>) attributes {dimension_semantics = [#tpu.dimension_semantics<parallel>], iteration_bounds = array<i64: 1>, scalar_prefetch = 0 : i64, scratch_operands = 0 : i64, tpu.core_type = #tpu.core_type<tc>, window_params = [{transform_indices = @transform_0, window_bounds = array<i64: 128, 11>}, {pipeline_mode = #tpu.pipeline_mode<synchronous>, transform_indices = @transform_1, window_bounds = array<i64: 11, 256>}, {pipeline_mode = #tpu.pipeline_mode<synchronous>, transform_indices = @transform_2, window_bounds = array<i64: 1, 256>}, {pipeline_mode = #tpu.pipeline_mode<synchronous>, transform_indices = @transform_3, window_bounds = array<i64: 3, 256>}, {pipeline_mode = #tpu.pipeline_mode<synchronous>, transform_indices = @transform_4, window_bounds = array<i64: 3, 1>}, {transform_indices = @transform_5, window_bounds = array<i64: 3, 128>}]} {
    %c0 = arith.constant 0 : index
    %c0_0 = arith.constant 0 : index
    %0 = vector.load %arg1[%c0, %c0_0] : memref<128x11xf32, #tpu.memory_space<vmem>>, vector<128x11xf32>
    %c0_1 = arith.constant 0 : index
    %c0_2 = arith.constant 0 : index
    %1 = vector.load %arg2[%c0_1, %c0_2] : memref<11x256xf32, #tpu.memory_space<vmem>>, vector<11x256xf32>
    %cst = arith.constant dense<0.000000e+00> : vector<128x256xf32>
    %2 = tpu.matmul %0, %1, %cst {dimension_numbers = #tpu.dot_dimension_numbers<[1], [0], [0], [1], [0, 0, 1, 1], [], []>} : vector<128x11xf32>, vector<11x256xf32>, vector<128x256xf32> -> vector<128x256xf32>
    %c0_3 = arith.constant 0 : index
    %c0_4 = arith.constant 0 : index
    %3 = vector.load %arg3[%c0_3, %c0_4] : memref<1x256xf32, #tpu.memory_space<vmem>>, vector<1x256xf32>
    %4 = vector.broadcast %3 : vector<1x256xf32> to vector<128x256xf32>
    %5 = arith.addf %2, %4 : vector<128x256xf32>
    %cst_5 = arith.constant 0.000000e+00 : f32
    %6 = vector.broadcast %cst_5 : f32 to vector<128x256xf32>
    %7 = arith.maximumf %5, %6 : vector<128x256xf32>
    %c0_6 = arith.constant 0 : index
    %c0_7 = arith.constant 0 : index
    %8 = vector.load %arg4[%c0_6, %c0_7] : memref<3x256xf32, #tpu.memory_space<vmem>>, vector<3x256xf32>
    %cst_8 = arith.constant dense<0.000000e+00> : vector<3x128xf32>
    %9 = tpu.matmul %8, %7, %cst_8 {dimension_numbers = #tpu.dot_dimension_numbers<[1], [1], [0], [0], [0, 0, 1, 0], [], []>} : vector<3x256xf32>, vector<128x256xf32>, vector<3x128xf32> -> vector<3x128xf32>
    %c0_9 = arith.constant 0 : index
    %c0_10 = arith.constant 0 : index
    %10 = vector.load %arg5[%c0_9, %c0_10] : memref<3x1xf32, #tpu.memory_space<vmem>>, vector<3x1xf32>
    %11 = vector.broadcast %10 : vector<3x1xf32> to vector<3x128xf32>
    %12 = arith.addf %9, %11 : vector<3x128xf32>
    %c0_11 = arith.constant 0 : index
    %c0_12 = arith.constant 0 : index
    %13 = vector.load %arg6[%c0_11, %c0_12] : memref<3x128xf32, #tpu.memory_space<vmem>>, vector<3x128xf32>
    tpu.vector_store %arg6[%c0_11, %c0_12], %12 {strides = array<i32>} : memref<3x128xf32, #tpu.memory_space<vmem>>, vector<3x128xf32>,
    return
  }
  func.func @transform_0(%arg0: i32) -> (i32, i32) {
    %c0_i32 = arith.constant 0 : i32
    %c0_i32_0 = arith.constant 0 : i32
    return %arg0, %c0_i32 : i32, i32
  }
  func.func @transform_1(%arg0: i32) -> (i32, i32) {
    %c0_i32 = arith.constant 0 : i32
    %c0_i32_0 = arith.constant 0 : i32
    %c0_i32_1 = arith.constant 0 : i32
    return %c0_i32, %c0_i32_0 : i32, i32
  }
  func.func @transform_2(%arg0: i32) -> (i32, i32) {
    %c0_i32 = arith.constant 0 : i32
    %c0_i32_0 = arith.constant 0 : i32
    %c0_i32_1 = arith.constant 0 : i32
    return %c0_i32, %c0_i32_0 : i32, i32
  }
  func.func @transform_3(%arg0: i32) -> (i32, i32) {
    %c0_i32 = arith.constant 0 : i32
    %c0_i32_0 = arith.constant 0 : i32
    %c0_i32_1 = arith.constant 0 : i32
    return %c0_i32, %c0_i32_0 : i32, i32
  }
  func.func @transform_4(%arg0: i32) -> (i32, i32) {
    %c0_i32 = arith.constant 0 : i32
    %c0_i32_0 = arith.constant 0 : i32
    %c0_i32_1 = arith.constant 0 : i32
    return %c0_i32, %c0_i32_0 : i32, i32
  }
  func.func @transform_5(%arg0: i32) -> (i32, i32) {
    %c0_i32 = arith.constant 0 : i32
    %c0_i32_0 = arith.constant 0 : i32
    return %c0_i32, %arg0 : i32, i32
  }
}

</mosaic_0001>

<bundles_post_ra>
// kernel: linear_qnet_forward.1
= control target key start
LH: loop header
LB: loop body
LE: loop exit
PB: predicated region body
PF: predicated region fallthrough
CT: control target
= control target key end

     0   :  { %10 = vsyncpa [#allocation3], 0  ;;  %s489_s18 = smov [#allocation2]   ;;  %s654_s0 = inlined_call_operand.vmem [shape: f32[2,11], index: 0, kind: input, shape index: {}]   ;;  %s655_s1 = inlined_call_operand.hbm [shape: f32[11,256], index: 1, kind: input, shape index: {}]   ;;  %s656_s2 = inlined_call_operand.vmem [shape: f32[1,256], index: 2, kind: input, shape index: {}]   ;;  %s657_s3 = inlined_call_operand.vmem [shape: f32[3,256], index: 3, kind: input, shape index: {}]   ;;  %s658_s4 = inlined_call_operand.vmem [shape: f32[3,1], index: 4, kind: input, shape index: {}]   ;;  %s659_s5 = inlined_call_operand.vmem [shape: f32[3,2], index: 5, kind: output, shape index: {}]  }
   0x1   :  { %s18_s19 = sshll.u32 %s489_s18, 4  ;;  %s465_s22 = scalar_lea.hbm %s655_s1, 512  ;;  %s19_s19 = int_to_ptr.vmem [resolvable:$true] %s18_s19 }
   0x2   :  { %p466_p0 = scmp.ne.s32.totalorder %s655_s1, %s465_s22  ;;  %p469_p1 = scmp.lt.u32.totalorder %s465_s22, %s655_s1 }
   0x4   :  { %p471_p2 = pnand %p469_p1, %p466_p0 }
   0x6   :  { %474 = shalt.err (!%p471_p2)
}
   0x7   :  { %s475_s27 = scalar_lea.vmem %s19_s19, 512  ;;  %p480_p4 = scmp.lt.s32.totalorder %s19_s19, %s19_s19 }
   0x8   :  { %p476_p3 = scmp.ne.s32.totalorder %s19_s19, %s475_s27  ;;  %p481_p5 = scmp.lt.s32.totalorder %s475_s27, %s475_s27 }
   0xa   :  { %p482_p6 = por %p481_p5, %p480_p4 }
   0xc   :  { %p483_p7 = pnand %p482_p6, %p476_p3 }
   0xe   :  { %486 = shalt.err (!%p483_p7)
}
   0xf   :  { %s490_s28 = smov 256   ;;  %s491_s29 = smov 16  }
  0x10   :  { %24 = dma.hbm_to_vmem [thread:$0]  %s655_s1, 512, %s19_s19, [#allocation3], %s490_s28, %s490_s28, %s491_s29  }
  0x11   :  { %487 = dma.done.wait [#allocation3], 512  }
  0x12   :  { %488 = vsyncadd [#allocation3], 4294966784  ;;  %v492_v0 = vmov 0.0   ;;  %vm115_vm0 = vcmask 1042432   ;;  %vm493_vm1 = vmmov 1   ;;  %v51_v1 = vld [vmem:[#allocation2 + $0x8] sm:$0xff]  ;;  %v56_v27 = vlaneseq }
  0x13   :  { %186 = vmatprep.mubr.f32.mxu0 %v492_v0  ;;  %vm420_vm2 = vmpackc.low %vm115_vm0, %vm493_vm1  ;;  %v53_v2 = vld [vmem:[#allocation2 + $0x18] sm:$0x7]  ;;  %v50_v3 = vld [vmem:[#allocation2] sm:$0xff]  ;;  %vm66_vm3 = vcmask 89088   ;;  %v494_v26 = vmov 0  }
  0x14   :  { %v419_v4 = vpack.c.bf16 %v53_v2, %v51_v1  ;;  %v52_v5 = vld [vmem:[#allocation2 + $0x10] sm:$0x7]  ;;  %v34_v7 = vld [vmem:[%s654_s0] sm:$0xff]  ;;  %v35_v8 = vld [vmem:[%s654_s0 + $0x8] sm:$0xff]  ;;  %463 = vset.pattern.permute.xlu0 %v494_v26  ;;  %v57_v28 = vshrl.u32 %v56_v27, 7 }
  0x15   :  { %v422_v6 = vpack.c.bf16 %v52_v5, %v50_v3  ;;  %v36_v9 = vld [vmem:[%s654_s0 + $0x10] sm:$0xff]  ;;  %v37_v10 = vld [vmem:[%s654_s0 + $0x18] sm:$0xff]  ;;  %v38_v11 = vld [vmem:[%s654_s0 + $0x20] sm:$0xff] }
  0x16   :  { %421 = vmatprep.subr.msk.bf16.mxu0 %vm420_vm2, %v419_v4  ;;  %v39_v12 = vld [vmem:[%s654_s0 + $0x28] sm:$0xff]  ;;  %v40_v13 = vld [vmem:[%s654_s0 + $0x30] sm:$0xff]  ;;  %v41_v14 = vld [vmem:[%s654_s0 + $0x38] sm:$0xff]  ;;  %v58_v29 = vsub.s32 0, %v57_v28  ;;  %v62_v31 = vsub.s32 1, %v57_v28 }
  0x17   :  { %424 = vmatpush1.bf16.msk.msra.mxu0 %vm420_vm2, %v422_v6  ;;  %v42_v15 = vld [vmem:[%s654_s0 + $0x40] sm:$0xff]  ;;  %v43_v16 = vld [vmem:[%s654_s0 + $0x48] sm:$0xff]  ;;  %v44_v17 = vld [vmem:[%s654_s0 + $0x50] sm:$0xff] }
  0x18   :  { %v45_v18 = vld [vmem:[%s654_s0 + $0x58] sm:$0xff]  ;;  %v46_v19 = vld [vmem:[%s654_s0 + $0x60] sm:$0xff]  ;;  %v47_v20 = vld [vmem:[%s654_s0 + $0x68] sm:$0xff] }
  0x19   :  { %v48_v21 = vld [vmem:[%s654_s0 + $0x70] sm:$0xff]  ;;  %v49_v22 = vld [vmem:[%s654_s0 + $0x78] sm:$0xff]  ;;  %v604_v23 = vld [vmem:[%s657_s3] sm:$0x77] }
  0x1a   :  { %403 = vmatmul.mubr.msk.f32.vlgmr.msra.gmra.mrb[0].mxu0 %vm66_vm3, %v34_v7  ;;  %v323_v24 = vcombine.high %v604_v23, %v604_v23  ;;  %v316_v25 = vld [vmem:[%s658_s4] sm:$0x7] }
  0x1b   :  { %192 = vmatprep.mubr.f32.mxu0 %v492_v0  ;;  %319 = vperm.xlu0 %463, %v316_v25   ;;  %v54_v30 = vld [vmem:[%s656_s2] sm:$0x3] }
  0x1c   :  { %389 = vmatprep.mubr.f32.mxu1 %v323_v24  ;;  %v614_v32 = vrot.slane %v54_v30, %v58_v29  ;;  %v616_v34 = vrot.slane %v54_v30, %v62_v31 }
  0x1e   :  { %404 = vmatmul.mubr.msk.f32.gmra.mrb[2].mxu0 %vm66_vm3, %v35_v8 }
  0x1f   :  { %198 = vmatprep.mubr.f32.mxu0 %v492_v0 }
  0x22   :  { %405 = vmatmul.mubr.msk.f32.gmra.mrb[4].mxu0 %vm66_vm3, %v36_v9 }
  0x23   :  { %204 = vmatprep.mubr.f32.mxu0 %v492_v0 }
  0x26   :  { %406 = vmatmul.mubr.msk.f32.gmra.mrb[6].mxu0 %vm66_vm3, %v37_v10 }
  0x27   :  { %210 = vmatprep.mubr.f32.mxu0 %v492_v0 }
  0x2a   :  { %407 = vmatmul.mubr.msk.f32.gmra.mrb[8].mxu0 %vm66_vm3, %v38_v11 }
  0x2b   :  { %216 = vmatprep.mubr.f32.mxu0 %v492_v0 }
  0x2e   :  { %408 = vmatmul.mubr.msk.f32.gmra.mrb[10].mxu0 %vm66_vm3, %v39_v12 }
  0x2f   :  { %222 = vmatprep.mubr.f32.mxu0 %v492_v0 }
  0x32   :  { %409 = vmatmul.mubr.msk.f32.gmra.mrb[12].mxu0 %vm66_vm3, %v40_v13 }
  0x33   :  { %228 = vmatprep.mubr.f32.mxu0 %v492_v0 }
  0x36   :  { %410 = vmatmul.mubr.msk.f32.gmra.mrb[14].mxu0 %vm66_vm3, %v41_v14 }
  0x37   :  { %234 = vmatprep.mubr.f32.mxu0 %v492_v0 }
  0x3a   :  { %411 = vmatmul.mubr.msk.f32.gmra.mrb[16].mxu0 %vm66_vm3, %v42_v15 }
  0x3b   :  { %240 = vmatprep.mubr.f32.mxu0 %v492_v0 }
  0x3e   :  { %412 = vmatmul.mubr.msk.f32.gmra.mrb[18].mxu0 %vm66_vm3, %v43_v16 }
  0x3f   :  { %246 = vmatprep.mubr.f32.mxu0 %v492_v0 }
  0x42   :  { %413 = vmatmul.mubr.msk.f32.gmra.mrb[20].mxu0 %vm66_vm3, %v44_v17 }
  0x43   :  { %252 = vmatprep.mubr.f32.mxu0 %v492_v0 }
  0x46   :  { %414 = vmatmul.mubr.msk.f32.gmra.mrb[22].mxu0 %vm66_vm3, %v45_v18 }
  0x47   :  { %258 = vmatprep.mubr.f32.mxu0 %v492_v0 }
  0x4a   :  { %415 = vmatmul.mubr.msk.f32.gmra.mrb[24].mxu0 %vm66_vm3, %v46_v19 }
  0x4b   :  { %264 = vmatprep.mubr.f32.mxu0 %v492_v0 }
  0x4e   :  { %416 = vmatmul.mubr.msk.f32.gmra.mrb[26].mxu0 %vm66_vm3, %v47_v20 }
  0x4f   :  { %270 = vmatprep.mubr.f32.mxu0 %v492_v0 }
  0x52   :  { %417 = vmatmul.mubr.msk.f32.gmra.mrb[28].mxu0 %vm66_vm3, %v48_v21 }
  0x53   :  { %276 = vmatprep.mubr.f32.mxu0 %v492_v0 }
  0x56   :  { %418 = vmatmul.mubr.msk.f32.gmra.mrb[30].mxu0 %vm66_vm3, %v49_v22 }
  0xed   :  { %v188_v33 = vpop.f32.mrb[0].mxu0 }
  0xee   :  { %v190_v35 = vpop.f32.mrb[1].mxu0  ;;  %v189_v36 = vadd.f32 %v188_v33, %v614_v32 }
  0xef   :  { %v191_v37 = vadd.f32 %v190_v35, %v616_v34 }
  0xf0   :  { %v283_v42 = vmax.f32 %v189_v36, 0.0 }
  0xf1   :  { %v194_v38 = vpop.f32.mrb[2].mxu0  ;;  %v284_v44 = vmax.f32 %v191_v37, 0.0 }
  0xf2   :  { %v195_v39 = vadd.f32 %v194_v38, %v614_v32  ;;  %v196_v40 = vpop.f32.mrb[3].mxu0 }
  0xf3   :  { %v197_v41 = vadd.f32 %v196_v40, %v616_v34 }
  0xf4   :  { %v285_v43 = vmax.f32 %v195_v39, 0.0 }
  0xf5   :  { %v286_v45 = vmax.f32 %v197_v41, 0.0  ;;  %v200_v46 = vpop.f32.mrb[4].mxu0 }
  0xf6   :  { %v202_v47 = vpop.f32.mrb[5].mxu0  ;;  %v427_v48 = vpack.c.bf16 %v285_v43, %v283_v42  ;;  %v201_v50 = vadd.f32 %v200_v46, %v614_v32 }
  0xf7   :  { %v425_v49 = vpack.c.bf16 %v286_v45, %v284_v44  ;;  %v203_v51 = vadd.f32 %v202_v47, %v616_v34 }
  0xf8   :  { %v287_v56 = vmax.f32 %v201_v50, 0.0 }
  0xf9   :  { %v206_v52 = vpop.f32.mrb[6].mxu0  ;;  %426 = vmatprep.subr.bf16.mxu1 %v425_v49  ;;  %v288_v58 = vmax.f32 %v203_v51, 0.0 }
  0xfa   :  { %v207_v53 = vadd.f32 %v206_v52, %v614_v32  ;;  %v208_v54 = vpop.f32.mrb[7].mxu0  ;;  %428 = vmatpush1.bf16.xpose.msra.mxu1 %v427_v48 }
  0xfb   :  { %v209_v55 = vadd.f32 %v208_v54, %v616_v34 }
  0xfc   :  { %v289_v57 = vmax.f32 %v207_v53, 0.0 }
  0xfd   :  { %v290_v59 = vmax.f32 %v209_v55, 0.0  ;;  %v212_v60 = vpop.f32.mrb[8].mxu0 }
  0xfe   :  { %v431_v61 = vpack.c.bf16 %v289_v57, %v287_v56  ;;  %v214_v62 = vpop.f32.mrb[9].mxu0  ;;  %v213_v0 = vadd.f32 %v212_v60, %v614_v32 }
  0xff   :  { %v429_v63 = vpack.c.bf16 %v290_v59, %v288_v58  ;;  %v215_v1 = vadd.f32 %v214_v62, %v616_v34 }
 0x100   :  { %v291_v6 = vmax.f32 %v213_v0, 0.0 }
 0x101   :  { %v218_v2 = vpop.f32.mrb[10].mxu0  ;;  %430 = vmatprep.subr.bf16.mxu1 %v429_v63  ;;  %v292_v8 = vmax.f32 %v215_v1, 0.0 }
 0x102   :  { %v219_v3 = vadd.f32 %v218_v2, %v614_v32  ;;  %v220_v4 = vpop.f32.mrb[11].mxu0  ;;  %432 = vmatpush1.bf16.xpose.msra.mxu1 %v431_v61 }
 0x103   :  { %v221_v5 = vadd.f32 %v220_v4, %v616_v34 }
 0x104   :  { %v293_v7 = vmax.f32 %v219_v3, 0.0 }
 0x105   :  { %v294_v9 = vmax.f32 %v221_v5, 0.0  ;;  %v224_v10 = vpop.f32.mrb[12].mxu0 }
 0x106   :  { %v435_v11 = vpack.c.bf16 %v293_v7, %v291_v6  ;;  %v226_v12 = vpop.f32.mrb[13].mxu0  ;;  %v225_v14 = vadd.f32 %v224_v10, %v614_v32 }
 0x107   :  { %v433_v13 = vpack.c.bf16 %v294_v9, %v292_v8  ;;  %v227_v15 = vadd.f32 %v226_v12, %v616_v34 }
 0x108   :  { %v295_v20 = vmax.f32 %v225_v14, 0.0 }
 0x109   :  { %v230_v16 = vpop.f32.mrb[14].mxu0  ;;  %434 = vmatprep.subr.bf16.mxu1 %v433_v13  ;;  %v296_v22 = vmax.f32 %v227_v15, 0.0 }
 0x10a   :  { %v231_v17 = vadd.f32 %v230_v16, %v614_v32  ;;  %v232_v18 = vpop.f32.mrb[15].mxu0  ;;  %436 = vmatpush1.bf16.xpose.msra.mxu1 %v435_v11 }
 0x10b   :  { %v233_v19 = vadd.f32 %v232_v18, %v616_v34 }
 0x10c   :  { %v297_v21 = vmax.f32 %v231_v17, 0.0 }
 0x10d   :  { %v298_v24 = vmax.f32 %v233_v19, 0.0  ;;  %v236_v25 = vpop.f32.mrb[16].mxu0 }
 0x10e   :  { %v439_v26 = vpack.c.bf16 %v297_v21, %v295_v20  ;;  %v238_v27 = vpop.f32.mrb[17].mxu0  ;;  %v237_v29 = vadd.f32 %v236_v25, %v614_v32  ;;  %v320_v21 = vpop.permute.xlu0 %319 }
 0x10f   :  { %v437_v28 = vpack.c.bf16 %v298_v24, %v296_v22  ;;  %v239_v30 = vadd.f32 %v238_v27, %v616_v34 }
 0x110   :  { %v299_v37 = vmax.f32 %v237_v29, 0.0 }
 0x111   :  { %v242_v31 = vpop.f32.mrb[18].mxu0  ;;  %438 = vmatprep.subr.bf16.mxu1 %v437_v28  ;;  %v300_v39 = vmax.f32 %v239_v30, 0.0 }
 0x112   :  { %v243_v33 = vadd.f32 %v242_v31, %v614_v32  ;;  %v244_v35 = vpop.f32.mrb[19].mxu0  ;;  %440 = vmatpush1.bf16.xpose.msra.mxu1 %v439_v26 }
 0x113   :  { %v245_v36 = vadd.f32 %v244_v35, %v616_v34 }
 0x114   :  { %v301_v38 = vmax.f32 %v243_v33, 0.0 }
 0x115   :  { %v302_v40 = vmax.f32 %v245_v36, 0.0  ;;  %v248_v41 = vpop.f32.mrb[20].mxu0 }
 0x116   :  { %v443_v42 = vpack.c.bf16 %v301_v38, %v299_v37  ;;  %v250_v43 = vpop.f32.mrb[21].mxu0  ;;  %v249_v45 = vadd.f32 %v248_v41, %v614_v32 }
 0x117   :  { %v441_v44 = vpack.c.bf16 %v302_v40, %v300_v39  ;;  %v251_v46 = vadd.f32 %v250_v43, %v616_v34 }
 0x118   :  { %v303_v51 = vmax.f32 %v249_v45, 0.0 }
 0x119   :  { %v254_v47 = vpop.f32.mrb[22].mxu0  ;;  %442 = vmatprep.subr.bf16.mxu1 %v441_v44  ;;  %v304_v53 = vmax.f32 %v251_v46, 0.0 }
 0x11a   :  { %v255_v48 = vadd.f32 %v254_v47, %v614_v32  ;;  %v256_v49 = vpop.f32.mrb[23].mxu0  ;;  %444 = vmatpush1.bf16.xpose.msra.mxu1 %v443_v42 }
 0x11b   :  { %v257_v50 = vadd.f32 %v256_v49, %v616_v34 }
 0x11c   :  { %v305_v52 = vmax.f32 %v255_v48, 0.0 }
 0x11d   :  { %v306_v54 = vmax.f32 %v257_v50, 0.0  ;;  %v260_v55 = vpop.f32.mrb[24].mxu0 }
 0x11e   :  { %v447_v56 = vpack.c.bf16 %v305_v52, %v303_v51  ;;  %v262_v57 = vpop.f32.mrb[25].mxu0  ;;  %v261_v59 = vadd.f32 %v260_v55, %v614_v32 }
 0x11f   :  { %v445_v58 = vpack.c.bf16 %v306_v54, %v304_v53  ;;  %v263_v60 = vadd.f32 %v262_v57, %v616_v34 }
 0x120   :  { %v307_v1 = vmax.f32 %v261_v59, 0.0 }
 0x121   :  { %v266_v61 = vpop.f32.mrb[26].mxu0  ;;  %446 = vmatprep.subr.bf16.mxu1 %v445_v58  ;;  %v308_v3 = vmax.f32 %v263_v60, 0.0 }
 0x122   :  { %v267_v62 = vadd.f32 %v266_v61, %v614_v32  ;;  %v268_v63 = vpop.f32.mrb[27].mxu0  ;;  %448 = vmatpush1.bf16.xpose.msra.mxu1 %v447_v56 }
 0x123   :  { %v269_v0 = vadd.f32 %v268_v63, %v616_v34 }
 0x124   :  { %v309_v2 = vmax.f32 %v267_v62, 0.0 }
 0x125   :  { %v310_v4 = vmax.f32 %v269_v0, 0.0  ;;  %v272_v5 = vpop.f32.mrb[28].mxu0 }
 0x126   :  { %v451_v6 = vpack.c.bf16 %v309_v2, %v307_v1  ;;  %v274_v7 = vpop.f32.mrb[29].mxu0  ;;  %v273_v9 = vadd.f32 %v272_v5, %v614_v32 }
 0x127   :  { %v449_v8 = vpack.c.bf16 %v310_v4, %v308_v3  ;;  %v275_v10 = vadd.f32 %v274_v7, %v616_v34 }
 0x128   :  { %v311_v15 = vmax.f32 %v273_v9, 0.0 }
 0x129   :  { %v278_v11 = vpop.f32.mrb[30].mxu0  ;;  %450 = vmatprep.subr.bf16.mxu1 %v449_v8  ;;  %v312_v17 = vmax.f32 %v275_v10, 0.0 }
 0x12a   :  { %v279_v12 = vadd.f32 %v278_v11, %v614_v32  ;;  %v280_v13 = vpop.f32.mrb[31].mxu0  ;;  %452 = vmatpush1.bf16.xpose.msra.mxu1 %v451_v6 }
 0x12b   :  { %v281_v14 = vadd.f32 %v280_v13, %v616_v34 }
 0x12c   :  { %v313_v16 = vmax.f32 %v279_v12, 0.0 }
 0x12d   :  { %v314_v18 = vmax.f32 %v281_v14, 0.0 }
 0x12e   :  { %v455_v19 = vpack.c.bf16 %v313_v16, %v311_v15 }
 0x12f   :  { %v453_v20 = vpack.c.bf16 %v314_v18, %v312_v17 }
 0x131   :  { %454 = vmatprep.subr.bf16.mxu1 %v453_v20 }
 0x132   :  { %456 = vmatpush1.bf16.xpose.msra.mxu1 %v455_v19 }
 0x139   :  { %390 = vmatmul.mubr.f32.vlgmr.msra.gmra.mrb[0].mxu1 %v604_v23 }
 0x20c   :  { %v391_v22 = vpop.f32.mrb[0].mxu1 }
 0x20d   :  { %v392_v24 = vadd.f32 %v391_v22, %v320_v21  ;;  %v393_v25 = vpop.f32.mrb[1].mxu1 }
 0x20f   :  { %395 = vst [vmem:[%s659_s5] sm:$0x7] %v392_v24 }
 0x210   :  { %400 = vsyncpa [#allocation3], 1 }

</bundles_post_ra>
